<compile_context>
chip_gen: v5e
topology: v5e:2x2
jax: 0.10.0
libtpu: 0.0.40
codegen_flags: <defaults>
</compile_context>

<pallas_src>
import functools

import jax
import jax.numpy as jnp
from jax.experimental import pallas as pl
from jax.experimental.pallas import tpu as pltpu

BN_EPS = 1e-5


def _round_up(n, m):
    return ((n + m - 1) // m) * m


def _vmem_capacity_bytes():
    """Physical VMEM per core; conservative (v7x) fallback if query fails."""
    try:
        info = pltpu.get_tpu_info()
        cap = getattr(info, "vmem_capacity_bytes", None)
        if cap:
            return int(cap)
    except Exception:
        pass
    return 64 << 20


# ---------------------------------------------------------------------------
# Fused path: whole x resident in VMEM, single kernel, x read from HBM once.
# ---------------------------------------------------------------------------
def _fused_kernel(n_rows, x_ref, gamma_ref, beta_ref, w_ref, b_ref, out_ref):
    """x_ref (B,F); gamma/beta/w (1,F); b (1,1) SMEM; out (B,1)."""
    x = x_ref[...]                                              # (B, F)
    inv_n = 1.0 / float(n_rows)
    mean = jnp.sum(x, axis=0, keepdims=True) * inv_n            # (1, F)
    xc = x - mean
    var = jnp.sum(xc * xc, axis=0, keepdims=True) * inv_n       # biased, centered
    g_inv = gamma_ref[...] * jax.lax.rsqrt(var + BN_EPS)        # (1, F)
    w = w_ref[...]                                              # (1, F)
    scale = g_inv * w                                           # (1, F)
    shift = b_ref[0, 0] + jnp.sum((beta_ref[...] - mean * g_inv) * w)
    # x already lives in VMEM: a broadcast multiply + lane reduce is plenty here.
    z = jnp.sum(x * scale, axis=1, keepdims=True) + shift       # (B, 1)
    out_ref[...] = jax.nn.sigmoid(z)


# ---------------------------------------------------------------------------
# Streaming path, pass 1: per-tile centered partial statistics (parallel grid)
# ---------------------------------------------------------------------------
def _tile_stats_kernel(n_rows, x_ref, stats_ref):
    """x_ref (TB,F) batch-major tile (rows >= n_rows are garbage and masked);
    stats_ref (1,8,F): sublane 0 = tile mean, sublane 1 = tile centered M2."""
    tb, f = x_ref.shape
    i = pl.program_id(0)
    valid = n_rows - i * tb                                     # traced int, >= 1
    row = jax.lax.broadcasted_iota(jnp.int32, (tb, 1), 0)
    mask = row < valid                                          # (TB, 1)
    cnt = jnp.minimum(valid, tb).astype(jnp.float32)
    xt = x_ref[...]
    xm = jnp.where(mask, xt, 0.0)
    m = jnp.sum(xm, axis=0, keepdims=True) / cnt                # (1, F) tile mean
    d = jnp.where(mask, xt - m, 0.0)
    m2 = jnp.sum(d * d, axis=0, keepdims=True)                  # (1, F) centered SSQ
    sub = jax.lax.broadcasted_iota(jnp.int32, (8, f), 0)
    stats = jnp.where(sub == 0, m, 0.0) + jnp.where(sub == 1, m2, 0.0)
    stats_ref[...] = stats[None]                                # (1, 8, F)


# ---------------------------------------------------------------------------
# Streaming path, pass 2: folded BN + linear (MXU dot) + sigmoid
# ---------------------------------------------------------------------------
def _predict_kernel(x_ref, scale_ref, shift_ref, out_ref):
    """x_ref (TB,F); scale_ref (F,1); shift_ref (1,1) SMEM; out_ref (TB,1)."""
    z = jnp.dot(x_ref[...], scale_ref[...],
                preferred_element_type=jnp.float32)             # (TB, 1) on MXU
    out_ref[...] = jax.nn.sigmoid(z + shift_ref[0, 0])


def logistic_regression_forward(x, gamma, beta, w, b, *, tile_b=8192, fused=None):
    """x: (B, F) f32; gamma, beta: (F,) BN affine; w: (1, F) fc.weight; b: (1,).

    Returns sigmoid(fc(bn(x))) with shape (B, 1), matching the PyTorch module.
    """
    B, F = x.shape
    x32 = x.astype(jnp.float32)
    gamma_r = gamma.reshape(1, F).astype(jnp.float32)
    beta_r = beta.reshape(1, F).astype(jnp.float32)
    w_r = w.reshape(1, F).astype(jnp.float32)
    b_c = b.reshape(1, 1).astype(jnp.float32)

    vmem_cap = _vmem_capacity_bytes()
    budget = (vmem_cap * 3) // 4                       # leave headroom below physical
    # In-VMEM footprint of x: lanes pad F=30 -> 128, sublanes pad to 8.
    x_vmem_bytes = _round_up(B, 8) * 128 * 4
    fused_fits = (3 * x_vmem_bytes + (4 << 20)) <= budget
    if fused is None:
        fused = fused_fits

    smem_spec = pl.BlockSpec(memory_space=pltpu.MemorySpace.SMEM)

    if fused:
        vmem_spec = pl.BlockSpec(memory_space=pltpu.MemorySpace.VMEM)
        limit = int(min(budget, max(32 << 20, 3 * x_vmem_bytes + (4 << 20))))
        return pl.pallas_call(
            functools.partial(_fused_kernel, B),
            out_shape=jax.ShapeDtypeStruct((B, 1), jnp.float32),
            in_specs=[vmem_spec, vmem_spec, vmem_spec, vmem_spec, smem_spec],
            out_specs=vmem_spec,
            compiler_params=pltpu.CompilerParams(vmem_limit_bytes=limit),
            cost_estimate=pl.CostEstimate(
                flops=int(7 * B * F), transcendentals=int(B),
                bytes_accessed=int((B * F + B + 4 * F) * 4)),
        )(x32, gamma_r, beta_r, w_r, b_c)

    # ---------------- Streaming two-pass path ----------------
    tb = min(int(tile_b), _round_up(B, 8))
    tb = max(8, (tb // 8) * 8)
    # Cap the tile so double-buffered (tb,30)->(tb,128)-padded blocks fit VMEM.
    max_tb = max(8, (((budget - (8 << 20)) // (4 * 512)) // 8) * 8)
    tb = min(tb, max_tb)
    n_tiles = pl.cdiv(B, tb)
    b_pad = n_tiles * tb
    limit = int(min(budget, max(32 << 20, 4 * tb * 512 + (8 << 20))))

    # Pass 1: per-tile centered partial stats; fully parallel grid (no
    # cross-step accumulator), so v7x can shard it across both TensorCores.
    stats = pl.pallas_call(
        functools.partial(_tile_stats_kernel, B),
        out_shape=jax.ShapeDtypeStruct((n_tiles, 8, F), jnp.float32),
        grid=(n_tiles,),
        in_specs=[pl.BlockSpec((tb, F), lambda i: (i, 0))],
        out_specs=pl.BlockSpec((1, 8, F), lambda i: (i, 0, 0)),
        compiler_params=pltpu.CompilerParams(
            dimension_semantics=("parallel",), vmem_limit_bytes=limit),
        cost_estimate=pl.CostEstimate(
            flops=int(5 * B * F), transcendentals=0,
            bytes_accessed=int((B * F + n_tiles * 8 * F) * 4)),
    )(x32)

    # Combine per-tile stats (parallel-variance / Chan formula) and fold BN
    # into the linear layer — tiny (n_tiles, F) math, plain XLA.
    counts = jnp.full((n_tiles,), float(tb), jnp.float32)
    counts = counts.at[-1].set(float(B - (n_tiles - 1) * tb))
    means = stats[:, 0, :]                                       # (n_tiles, F)
    m2s = stats[:, 1, :]                                         # (n_tiles, F)
    mean = jnp.sum(means * counts[:, None], axis=0) / float(B)   # (F,)
    var = (jnp.sum(m2s, axis=0)
           + jnp.sum(counts[:, None] * (means - mean[None, :]) ** 2, axis=0)) / float(B)
    var = jnp.maximum(var, 0.0)                                  # biased, as PyTorch BN
    g_inv = gamma.astype(jnp.float32) * jax.lax.rsqrt(var + BN_EPS)   # (F,)
    w_vec = w.reshape(F).astype(jnp.float32)
    scale = (g_inv * w_vec).reshape(F, 1)
    shift = (b.reshape(()).astype(jnp.float32)
             + jnp.sum((beta.astype(jnp.float32) - mean * g_inv) * w_vec)).reshape(1, 1)

    # Pass 2: folded linear on the MXU + sigmoid, streamed over the batch.
    out_pad = pl.pallas_call(
        _predict_kernel,
        out_shape=jax.ShapeDtypeStruct((b_pad, 1), jnp.float32),
        grid=(n_tiles,),
        in_specs=[pl.BlockSpec((tb, F), lambda i: (i, 0)),
                  pl.BlockSpec((F, 1), lambda i: (0, 0)),
                  smem_spec],
        out_specs=pl.BlockSpec((tb, 1), lambda i: (i, 0)),
        compiler_params=pltpu.CompilerParams(
            dimension_semantics=("parallel",), vmem_limit_bytes=limit),
        cost_estimate=pl.CostEstimate(
            flops=int(2 * B * F + 2 * B), transcendentals=int(B),
            bytes_accessed=int((B * F + b_pad + F) * 4)),
    )(x32, scale, shift)

    return out_pad[:B]


def init_params(input_size=30, seed=0):
    """Deterministic parameter init mirroring the PyTorch module's __init__."""
    key = jax.random.PRNGKey(seed)
    # Xavier-uniform for fc.weight (shape (1, input_size)), gain('sigmoid') == 1.0
    fan_in, fan_out = input_size, 1
    bound = (6.0 / (fan_in + fan_out)) ** 0.5
    w = jax.random.uniform(key, (1, input_size), jnp.float32, -bound, bound)
    b = jnp.zeros((1,), jnp.float32)                  # fc.bias = 0
    gamma = jnp.ones((input_size,), jnp.float32)      # BN weight
    beta = jnp.zeros((input_size,), jnp.float32)      # BN bias
    return gamma, beta, w, b


def _reference_forward(x, gamma, beta, w, b):
    """Pure-JAX reference: BatchNorm1d(train) -> Linear -> Sigmoid."""
    mean = jnp.mean(x, axis=0, keepdims=True)
    var = jnp.mean((x - mean) ** 2, axis=0, keepdims=True)       # biased
    xn = (x - mean) * jax.lax.rsqrt(var + BN_EPS) * gamma[None, :] + beta[None, :]
    z = xn @ w.T + b[None, :]
    return jax.nn.sigmoid(z)


if __name__ == "__main__":
    input_size = 30
    gamma, beta, w, b = init_params(input_size=input_size, seed=0)

    # Small batch: fused single-kernel path (whole x resident in VMEM).
    batch = 8
    x = jax.random.normal(jax.random.PRNGKey(0), (batch, input_size), jnp.float32)
    out = jax.block_until_ready(logistic_regression_forward(x, gamma, beta, w, b))
    assert out.shape == (batch, 1) and out.dtype == jnp.float32
    assert bool(jnp.all((out >= 0.0) & (out <= 1.0)))
    ref = _reference_forward(x, gamma, beta, w, b)
    assert bool(jnp.allclose(out, ref, rtol=1e-5, atol=2e-5)), "mismatch (fused, B=8)"

    # Larger batch with a non-zero mean (stresses the variance computation).
    batch2 = 640
    x2 = 5.0 + 2.0 * jax.random.normal(jax.random.PRNGKey(1), (batch2, input_size),
                                       jnp.float32)
    out2 = jax.block_until_ready(logistic_regression_forward(x2, gamma, beta, w, b))
    ref2 = _reference_forward(x2, gamma, beta, w, b)
    assert out2.shape == (batch2, 1)
    assert bool(jnp.allclose(out2, ref2, rtol=1e-5, atol=2e-5)), "mismatch (fused, B=640)"

    # Force the streaming two-pass path with a small tile so the gridded,
    # masked-remainder code path is exercised (600 is not a multiple of 256).
    batch3 = 600
    x3 = 3.0 + jax.random.normal(jax.random.PRNGKey(2), (batch3, input_size), jnp.float32)
    out3 = jax.block_until_ready(
        logistic_regression_forward(x3, gamma, beta, w, b, tile_b=256, fused=False))
    ref3 = _reference_forward(x3, gamma, beta, w, b)
    assert out3.shape == (batch3, 1)
    assert bool(jnp.allclose(out3, ref3, rtol=1e-5, atol=2e-5)), "mismatch (streaming, B=600)"

    print("KERNEL_OK")
</pallas_src>

<mosaic_0001>
module attributes {stable_mosaic.version = 11 : i64} {
  func.func @_fused_kernel(%arg0: memref<8x30xf32, #tpu.memory_space<vmem>>, %arg1: memref<1x30xf32, #tpu.memory_space<vmem>>, %arg2: memref<1x30xf32, #tpu.memory_space<vmem>>, %arg3: memref<1x30xf32, #tpu.memory_space<vmem>>, %arg4: memref<1x1xf32, #tpu.memory_space<smem>>, %arg5: memref<8x1xf32, #tpu.memory_space<vmem>>) attributes {dimension_semantics = [], scalar_prefetch = 0 : i64, scratch_operands = 0 : i64, tpu.core_type = #tpu.core_type<tc>} {
    %c0 = arith.constant 0 : index
    %c0_0 = arith.constant 0 : index
    %0 = vector.load %arg0[%c0, %c0_0] : memref<8x30xf32, #tpu.memory_space<vmem>>, vector<8x30xf32>
    %cst = arith.constant dense<0.000000e+00> : vector<30xf32>
    %1 = vector.multi_reduction <add>, %0, %cst [0] : vector<8x30xf32> to vector<30xf32>
    %2 = vector.shape_cast %1 : vector<30xf32> to vector<1x30xf32>
    %cst_1 = arith.constant 1.250000e-01 : f32
    %3 = vector.broadcast %cst_1 : f32 to vector<1x30xf32>
    %4 = arith.mulf %2, %3 : vector<1x30xf32>
    %5 = vector.broadcast %4 : vector<1x30xf32> to vector<8x30xf32>
    %6 = arith.subf %0, %5 : vector<8x30xf32>
    %7 = arith.mulf %6, %6 : vector<8x30xf32>
    %cst_2 = arith.constant dense<0.000000e+00> : vector<30xf32>
    %8 = vector.multi_reduction <add>, %7, %cst_2 [0] : vector<8x30xf32> to vector<30xf32>
    %9 = vector.shape_cast %8 : vector<30xf32> to vector<1x30xf32>
    %cst_3 = arith.constant 1.250000e-01 : f32
    %10 = vector.broadcast %cst_3 : f32 to vector<1x30xf32>
    %11 = arith.mulf %9, %10 : vector<1x30xf32>
    %c0_4 = arith.constant 0 : index
    %c0_5 = arith.constant 0 : index
    %12 = vector.load %arg1[%c0_4, %c0_5] : memref<1x30xf32, #tpu.memory_space<vmem>>, vector<1x30xf32>
    %cst_6 = arith.constant 9.99999974E-6 : f32
    %13 = vector.broadcast %cst_6 : f32 to vector<1x30xf32>
    %14 = arith.addf %11, %13 : vector<1x30xf32>
    %15 = math.rsqrt %14 : vector<1x30xf32>
    %16 = arith.mulf %12, %15 : vector<1x30xf32>
    %c0_7 = arith.constant 0 : index
    %c0_8 = arith.constant 0 : index
    %17 = vector.load %arg3[%c0_7, %c0_8] : memref<1x30xf32, #tpu.memory_space<vmem>>, vector<1x30xf32>
    %18 = arith.mulf %16, %17 : vector<1x30xf32>
    %c0_9 = arith.constant 0 : index
    %c0_10 = arith.constant 0 : index
    %19 = memref.load %arg4[%c0_9, %c0_10] : memref<1x1xf32, #tpu.memory_space<smem>>
    %c0_11 = arith.constant 0 : index
    %c0_12 = arith.constant 0 : index
    %20 = vector.load %arg2[%c0_11, %c0_12] : memref<1x30xf32, #tpu.memory_space<vmem>>, vector<1x30xf32>
    %21 = arith.mulf %4, %16 : vector<1x30xf32>
    %22 = arith.subf %20, %21 : vector<1x30xf32>
    %23 = arith.mulf %22, %17 : vector<1x30xf32>
    %24 = vector.shape_cast %23 : vector<1x30xf32> to vector<1x1x30xf32>
    %cst_13 = arith.constant dense<0.000000e+00> : vector<1xf32>
    %25 = vector.multi_reduction <add>, %24, %cst_13 [1, 2] : vector<1x1x30xf32> to vector<1xf32>
    %26 = vector.shape_cast %25 : vector<1xf32> to vector<1x1x1xf32>
    %27 = vector.extract %26[0, 0, 0] : f32 from vector<1x1x1xf32>
    %28 = arith.addf %19, %27 : f32
    %29 = vector.broadcast %18 : vector<1x30xf32> to vector<8x30xf32>
    %30 = arith.mulf %0, %29 : vector<8x30xf32>
    %cst_14 = arith.constant dense<0.000000e+00> : vector<8xf32>
    %31 = vector.multi_reduction <add>, %30, %cst_14 [1] : vector<8x30xf32> to vector<8xf32>
    %32 = vector.shape_cast %31 : vector<8xf32> to vector<8x1xf32>
    %33 = vector.broadcast %28 : f32 to vector<8x1xf32>
    %34 = arith.addf %32, %33 : vector<8x1xf32>
    %35 = arith.negf %34 : vector<8x1xf32>
    %36 = math.exp %35 : vector<8x1xf32>
    %cst_15 = arith.constant 1.000000e+00 : f32
    %37 = vector.broadcast %cst_15 : f32 to vector<8x1xf32>
    %38 = arith.addf %37, %36 : vector<8x1xf32>
    %39 = arith.divf %37, %38 : vector<8x1xf32>
    %c0_16 = arith.constant 0 : index
    %c0_17 = arith.constant 0 : index
    %40 = vector.load %arg5[%c0_16, %c0_17] : memref<8x1xf32, #tpu.memory_space<vmem>>, vector<8x1xf32>
    tpu.vector_store %arg5[%c0_16, %c0_17], %39 {strides = array<i32>} : memref<8x1xf32, #tpu.memory_space<vmem>>, vector<8x1xf32>,
    return
  }
}

</mosaic_0001>

<bundles_post_ra>
// kernel: tpu_custom_call.1
= control target key start
LH: loop header
LB: loop body
LE: loop exit
PB: predicated region body
PF: predicated region fallthrough
CT: control target
= control target key end

     0   :  { %11 = vsyncpa [#allocation4], 0  ;;  %s158_s21 = smov [#allocation3]   ;;  %s210_s0 = inlined_call_operand.hbm [shape: f32[8,30], index: 0, kind: input, shape index: {}]   ;;  %s211_s1 = inlined_call_operand.vmem [shape: f32[1,30], index: 1, kind: input, shape index: {}]   ;;  %s212_s2 = inlined_call_operand.vmem [shape: f32[1,30], index: 2, kind: input, shape index: {}]   ;;  %s213_s3 = inlined_call_operand.vmem [shape: f32[1,30], index: 3, kind: input, shape index: {}]   ;;  %s214_s4 = inlined_call_operand.<no memory space> [shape: f32[1,1], index: 4, kind: input, shape index: {}]   ;;  %s215_s5 = inlined_call_operand.vmem [shape: f32[8,1], index: 5, kind: output, shape index: {}]  }
   0x1   :  { %s17_s20 = sshll.u32 %s210_s0, 4  ;;  %s19_s22 = sshll.u32 %s158_s21, 4  ;;  %s18_s20 = int_to_ptr.hbm [resolvable:$true] %s17_s20  ;;  %s20_s22 = int_to_ptr.vmem [resolvable:$true] %s19_s22 }
   0x2   :  { %22 = dma.hbm_to_vmem [thread:$0]  %s18_s20, 128, %s20_s22, [#allocation4]  }
   0x3   :  { %156 = dma.done.wait [#allocation4], 128  }
   0x4   :  { %157 = vsyncadd [#allocation4], 4294967168  ;;  %vm36_vm0 = vcmask 244736   ;;  %v35_v0 = vld [vmem:[#allocation3] sm:$0xff]  ;;  %vm75_vm4 = vcmask 237568   ;;  %vm115_vm7 = vcmask 7168  }
   0x5   :  { %v37_v1 = vsel %vm36_vm0, %v35_v0, 0.0  ;;  %v55_v25 = vld [vmem:[%s211_s1] sm:$0x1] }
   0x6   :  { %v38_v2 = vrot.slane %v37_v1, 4  ;;  %v68_v29 = vld [vmem:[%s213_s3] sm:$0x1] }
   0x7   :  { %v71_v30 = vld [vmem:[%s212_s2] sm:$0x1] }
   0x8   :  { %v39_v3 = vadd.f32 %v38_v2, %v37_v1 }
   0xa   :  { %v40_v4 = vrot.slane %v39_v3, 2 }
   0xc   :  { %v41_v5 = vadd.f32 %v40_v4, %v39_v3 }
   0xe   :  { %v42_v6 = vrot.slane %v41_v5, 1 }
  0x10   :  { %v43_v7 = vadd.f32 %v42_v6, %v41_v5 }
  0x12   :  { %v44_v8 = vmul.f32 0.125, %v43_v7 }
  0x14   :  { %v45_v9 = vsub.f32 %v35_v0, %v44_v8 }
  0x16   :  { %v46_v10 = vmul.f32 %v45_v9, %v45_v9 }
  0x18   :  { %v47_v11 = vsel %vm36_vm0, %v46_v10, 0.0 }
  0x19   :  { %v48_v12 = vrot.slane %v47_v11, 4 }
  0x1b   :  { %v49_v13 = vadd.f32 %v48_v12, %v47_v11 }
  0x1d   :  { %v50_v14 = vrot.slane %v49_v13, 2 }
  0x1f   :  { %v51_v15 = vadd.f32 %v50_v14, %v49_v13 }
  0x21   :  { %v52_v16 = vrot.slane %v51_v15, 1 }
  0x23   :  { %v53_v17 = vadd.f32 %v52_v16, %v51_v15 }
  0x25   :  { %v54_v18 = vmul.f32 0.125, %v53_v17 }
  0x27   :  { %v56_v19 = vadd.f32 1e-05, %v54_v18 }
  0x29   :  { %126 = vrsqrt.f32 %v56_v19  ;;  %vm63_vm1 = vweird.f32 %v56_v19 }
  0x2f   :  { %v127_v20 = vpop.eup %126 }
  0x30   :  { %v58_v21 = vmul.f32 %v127_v20, %v56_v19  ;;  %vm64_vm2 = vweird.f32 %v127_v20 }
  0x31   :  { %vm65_vm3 = vmor %vm63_vm1, %vm64_vm2 }
  0x32   :  { %v59_v22 = vmul.f32 %v127_v20, %v58_v21 }
  0x34   :  { %v60_v23 = vmul.f32 0.5, %v59_v22 }
  0x36   :  { %v61_v24 = vsub.f32 1.5, %v60_v23 }
  0x38   :  { %v62_v26 = vmul.f32 %v127_v20, %v61_v24 }
  0x3a   :  { %v66_v27 = vsel %vm65_vm3, %v127_v20, %v62_v26 }
  0x3b   :  { %v67_v28 = vmul.f32 %v66_v27, %v55_v25 }
  0x3d   :  { %v72_v31 = vmul.f32 %v67_v28, %v44_v8  ;;  %v69_v32 = vmul.f32 %v68_v29, %v67_v28 }
  0x3f   :  { %v73_v33 = vsub.f32 %v71_v30, %v72_v31  ;;  %v88_v34 = vperm.slane %v69_v32, 0 }
  0x41   :  { %v74_v35 = vmul.f32 %v73_v33, %v68_v29  ;;  %v90_v36 = vmul.f32 %v88_v34, %v35_v0 }
  0x43   :  { %v76_v37 = vsel %vm75_vm4, %v74_v35, 0.0  ;;  %v91_v38 = vsel %vm36_vm0, %v90_v36, 0.0 }
  0x44   :  { %77 = vadd.xlane.f32.xlu0 %v76_v37 }
  0x4c   :  { %92 = vadd.xlane.f32.xlu0 %v91_v38 }
  0xb7   :  { %v78_v39 = vpop.xlane.xlu0 %77 }
  0xb8   :  { %v79_v40 = vrot.slane %v78_v39, 4 }
  0xba   :  { %v80_v41 = vadd.f32 %v79_v40, %v78_v39 }
  0xbc   :  { %v81_v42 = vrot.slane %v80_v41, 2 }
  0xbe   :  { %v82_v43 = vadd.f32 %v81_v42, %v80_v41 }
  0xbf   :  { %v93_v46 = vpop.xlane.xlu0 %92 }
  0xc0   :  { %v83_v44 = vrot.slane %v82_v43, 1 }
  0xc2   :  { %v84_v45 = vadd.f32 %v83_v44, %v82_v43 }
  0xc4   :  { %123 = vpush %v84_v45 }
  0xf5   :  { %s124_s1 = spop %123 }
  0xf6   :  { %s86_s28 = sadd.f32 %s124_s1, %s214_s4 }
  0xf8   :  { %v94_v47 = vstv %s86_s28 }
  0xf9   :  { %v95_v48 = vadd.f32 %v94_v47, %v93_v46 }
  0xfb   :  { %v122_v49 = vmul.f32 -1.442695, %v95_v48 }
  0xfd   :  { %128 = vpow2.f32 %v122_v49 }
 0x103   :  { %v129_v50 = vpop.eup %128 }
 0x104   :  { %v99_v51 = vadd.f32 1.0, %v129_v50 }
 0x106   :  { %130 = vrcp.f32 %v99_v51  ;;  %v111_v55 = vand.u32 2147483648, %v99_v51  ;;  %v109_v57 = vand.u32 2147483647, %v99_v51  ;;  %vm105_vm6 = vweird.f32 %v99_v51 }
 0x108   :  { %v112_v59 = vor.u32 1.1754944e-38, %v111_v55  ;;  %vm110_vm9 = vcmp.eq.f32.partialorder %v109_v57, 8.507059e+37 }
 0x10c   :  { %v131_v52 = vpop.eup %130 }
 0x10d   :  { %v101_v53 = vmul.f32 %v131_v52, %v99_v51  ;;  %vm106_vm5 = vweird.f32 %v131_v52 }
 0x10e   :  { %vm107_vm8 = vmor %vm105_vm6, %vm106_vm5 }
 0x10f   :  { %v102_v54 = vsub.f32 1.0, %v101_v53 }
 0x111   :  { %v103_v56 = vmul.f32 %v131_v52, %v102_v54 }
 0x113   :  { %v104_v58 = vadd.f32 %v131_v52, %v103_v56 }
 0x115   :  { %v108_v60 = vsel %vm107_vm8, %v131_v52, %v104_v58 }
 0x116   :  { %v113_v61 = vsel %vm110_vm9, %v112_v59, %v108_v60 }
 0x117   :  { %116 = vst.msk [vmem:[%s215_s5] sm:$0xff] %vm115_vm7, %v113_v61 }
 0x118   :  { %121 = vsyncpa [#allocation4], 1 }

</bundles_post_ra>
